<compile_context>
chip_gen: v7x
topology: tpu7x:2x2x1
jax: 0.10.0
libtpu: 0.0.40
codegen_flags: <defaults>
</compile_context>

<pallas_src>
import functools

import jax
import jax.numpy as jnp
from jax import lax
from jax.experimental import pallas as pl
from jax.experimental.pallas import tpu as pltpu


def softmax_body_kernel(x_ref, u_ref, act_ref, *, T, num_actions):
    """One batch tile: x_ref (TB, A) logits, u_ref (TB, A) uniforms -> act_ref (1, TB) int32."""
    # Gumbel noise on the EUP (u is in [tiny, 1), so both logs are finite).
    u = u_ref[...]
    g = -jnp.log(-jnp.log(u))                                   # (TB, A)  EUP
    # Temperature-scaled logits + Gumbel noise (VPU).
    z = x_ref[...].astype(jnp.float32) * T + g                  # (TB, A)

    # Work in the transposed frame so the per-row result lands lane-dense.
    zt = jnp.transpose(z)                                       # (A, TB)  XLU
    m = jnp.max(zt, axis=0, keepdims=True)                      # (1, TB)  cross-sublane reduce
    a_idx = lax.broadcasted_iota(jnp.int32, zt.shape, 0)        # action index per sublane
    # First (lowest) index achieving the max; fill keeps result in [0, A-1].
    act = jnp.min(jnp.where(zt >= m, a_idx, num_actions - 1),
                  axis=0, keepdims=True)                        # (1, TB) int32
    act_ref[...] = act


def softmax_body(outputs, *, key, T, block_rows=1024):
    """outputs: (B, A) float32 Q-values -> (B, 1) int32 sampled actions (softmax(T*x) dist)."""
    B, A = outputs.shape
    outputs = outputs.astype(jnp.float32)

    # Uniforms in [tiny, 1): strictly positive and strictly below 1 so -log(-log(u)) is finite.
    u = jax.random.uniform(key, (B, A), dtype=jnp.float32,
                           minval=float(jnp.finfo(jnp.float32).tiny), maxval=1.0)

    # Batch tile: whole batch if small; otherwise block_rows (multiple of 8, multiple of 128
    # so the lane-dense output block is legal), falling back to a single block if B doesn't tile.
    if B <= block_rows or B % block_rows != 0:
        tb = B
    else:
        tb = block_rows
    grid = (B // tb,)

    kernel = functools.partial(softmax_body_kernel, T=float(T), num_actions=A)
    flat = pl.pallas_call(
        kernel,
        out_shape=jax.ShapeDtypeStruct((1, B), jnp.int32),
        grid=grid,
        in_specs=[
            pl.BlockSpec((tb, A), lambda i: (i, 0)),   # logits tile
            pl.BlockSpec((tb, A), lambda i: (i, 0)),   # uniform noise tile
        ],
        out_specs=pl.BlockSpec((1, tb), lambda i: (0, i)),      # lane-dense action row
        compiler_params=pltpu.CompilerParams(
            dimension_semantics=("parallel",)),
    )(outputs, u)

    return flat.reshape(B, 1)                                    # match PyTorch's (N, 1) shape


if __name__ == "__main__":
    key = jax.random.PRNGKey(0)
    k_q, k_samp = jax.random.split(key)

    B, A = 8, 8                       # small batch of Q-value rows, 8 actions
    outputs = jax.random.normal(k_q, (B, A), dtype=jnp.float32)
    T = 1.0                           # temperature from SoftmaxBody.__init__

    actions = softmax_body(outputs, key=k_samp, T=T)
    jax.block_until_ready(actions)

    assert actions.shape == (B, 1) and actions.dtype == jnp.int32
    assert bool(jnp.all((actions >= 0) & (actions < A)))
    print("KERNEL_OK")
</pallas_src>

<mosaic_0001>
module attributes {stable_mosaic.version = 11 : i64} {
  func.func @softmax_body_kernel(%arg0: i32, %arg1: memref<8x8xf32, #tpu.memory_space<vmem>>, %arg2: memref<8x8xf32, #tpu.memory_space<vmem>>, %arg3: memref<1x8xi32, #tpu.memory_space<vmem>>) attributes {dimension_semantics = [#tpu.dimension_semantics<parallel>], iteration_bounds = array<i64: 1>, scalar_prefetch = 0 : i64, scratch_operands = 0 : i64, tpu.core_type = #tpu.core_type<tc>, window_params = [{transform_indices = @transform_0, window_bounds = array<i64: 8, 8>}, {transform_indices = @transform_1, window_bounds = array<i64: 8, 8>}, {transform_indices = @transform_2, window_bounds = array<i64: 1, 8>}]} {
    %c0 = arith.constant 0 : index
    %c0_0 = arith.constant 0 : index
    %0 = vector.load %arg2[%c0, %c0_0] : memref<8x8xf32, #tpu.memory_space<vmem>>, vector<8x8xf32>
    %1 = math.log %0 : vector<8x8xf32>
    %cst = arith.constant 0.000000e+00 : f32
    %2 = vector.broadcast %cst : f32 to vector<8x8xf32>
    %3 = arith.subf %2, %1 : vector<8x8xf32>
    %4 = math.log %3 : vector<8x8xf32>
    %cst_1 = arith.constant 0.000000e+00 : f32
    %5 = vector.broadcast %cst_1 : f32 to vector<8x8xf32>
    %6 = arith.subf %5, %4 : vector<8x8xf32>
    %c0_2 = arith.constant 0 : index
    %c0_3 = arith.constant 0 : index
    %7 = vector.load %arg1[%c0_2, %c0_3] : memref<8x8xf32, #tpu.memory_space<vmem>>, vector<8x8xf32>
    %cst_4 = arith.constant 1.000000e+00 : f32
    %8 = vector.broadcast %cst_4 : f32 to vector<8x8xf32>
    %9 = arith.mulf %7, %8 : vector<8x8xf32>
    %10 = arith.addf %9, %6 : vector<8x8xf32>
    %11 = tpu.transpose %10, [1, 0] : vector<8x8xf32> -> vector<8x8xf32>
    %cst_5 = arith.constant dense<0xFF800000> : vector<8xf32>
    %12 = vector.multi_reduction <maximumf>, %11, %cst_5 [0] : vector<8x8xf32> to vector<8xf32>
    %13 = vector.shape_cast %12 : vector<8xf32> to vector<1x8xf32>
    %14 = tpu.iota {dimensions = array<i32: 0>} : vector<8x8xi32>
    %15 = vector.broadcast %13 : vector<1x8xf32> to vector<8x8xf32>
    %16 = arith.cmpf oge, %11, %15 : vector<8x8xf32>
    %c7_i32 = arith.constant 7 : i32
    %17 = vector.broadcast %c7_i32 : i32 to vector<8x8xi32>
    %18 = arith.select %16, %14, %17 : vector<8x8xi1>, vector<8x8xi32>
    %cst_6 = arith.constant dense<2147483647> : vector<8xi32>
    %19 = vector.multi_reduction <minsi>, %18, %cst_6 [0] : vector<8x8xi32> to vector<8xi32>
    %20 = vector.shape_cast %19 : vector<8xi32> to vector<1x8xi32>
    %c0_7 = arith.constant 0 : index
    %c0_8 = arith.constant 0 : index
    %21 = vector.load %arg3[%c0_7, %c0_8] : memref<1x8xi32, #tpu.memory_space<vmem>>, vector<1x8xi32>
    tpu.vector_store %arg3[%c0_7, %c0_8], %20 {strides = array<i32>} : memref<1x8xi32, #tpu.memory_space<vmem>>, vector<1x8xi32>,
    return
  }
  func.func @transform_0(%arg0: i32) -> (i32, i32) {
    %c0_i32 = arith.constant 0 : i32
    %c0_i32_0 = arith.constant 0 : i32
    return %arg0, %c0_i32 : i32, i32
  }
  func.func @transform_1(%arg0: i32) -> (i32, i32) {
    %c0_i32 = arith.constant 0 : i32
    %c0_i32_0 = arith.constant 0 : i32
    return %arg0, %c0_i32 : i32, i32
  }
  func.func @transform_2(%arg0: i32) -> (i32, i32) {
    %c0_i32 = arith.constant 0 : i32
    %c0_i32_0 = arith.constant 0 : i32
    return %c0_i32, %arg0 : i32, i32
  }
}

</mosaic_0001>

<bundles_post_ra>
// kernel: tpu_custom_call.1
= control target key start
LH: loop header
LB: loop body
LE: loop exit
PB: predicated region body
PF: predicated region fallthrough
CT: control target
= control target key end

     0   :  { %7 = vsyncpa [#allocation3], 0  ;;  %s251_s0 = inlined_call_operand.hbm [shape: f32[8,8], index: 0, kind: input, shape index: {}]   ;;  %s252_s1 = inlined_call_operand.hbm [shape: f32[8,8], index: 1, kind: input, shape index: {}]   ;;  %s253_s2 = inlined_call_operand.hbm [shape: s32[1,8], index: 2, kind: output, shape index: {}]  }
   0x1   :  { %8 = vsyncpa [#allocation6], 0 }
   0x2   :  { %9 = vsyncpa [#allocation4], 0  ;;  %s197_s9 = smov [#allocation2]   ;;  %s198_s11 = smov [#allocation5]  }
   0x3   :  { %s16_s10 = sshll.u32 %s197_s9, 4  ;;  %s26_s12 = sshll.u32 %s198_s11, 4  ;;  %s17_s10 = int_to_ptr.vmem [resolvable:$true] %s16_s10  ;;  %s27_s12 = int_to_ptr.vmem [resolvable:$true] %s26_s12 }
   0x4   :  { %s125_s15 = scalar_lea.hbm %s251_s0, 128 }
   0x5   :  { %p126_p0 = scmp.ne.s32.totalorder %s251_s0, %s125_s15  ;;  %p129_p1 = scmp.lt.u32.totalorder %s125_s15, %s251_s0 }
   0x7   :  { %p131_p2 = pnand %p129_p1, %p126_p0 }
   0x9   :  { %134 = shalt.err (!%p131_p2)
}
   0xa   :  { %s135_s20 = scalar_lea.vmem %s17_s10, 128  ;;  %p140_p4 = scmp.lt.s32.totalorder %s17_s10, %s17_s10 }
   0xb   :  { %p136_p3 = scmp.ne.s32.totalorder %s17_s10, %s135_s20  ;;  %p141_p5 = scmp.lt.s32.totalorder %s135_s20, %s135_s20 }
   0xd   :  { %p142_p6 = por %p141_p5, %p140_p4 }
   0xf   :  { %p143_p7 = pnand %p142_p6, %p136_p3 }
  0x11   :  { %146 = shalt.err (!%p143_p7)
}
  0x12   :  { %19 = dma.hbm_to_vmem [thread:$0]  %s251_s0, 128, %s17_s10, [#allocation3]  }
  0x13   :  { %s147_s25 = scalar_lea.hbm %s252_s1, 128 }
  0x14   :  { %p148_p8 = scmp.ne.s32.totalorder %s252_s1, %s147_s25  ;;  %p151_p9 = scmp.lt.u32.totalorder %s147_s25, %s252_s1 }
  0x16   :  { %p153_p10 = pnand %p151_p9, %p148_p8 }
  0x18   :  { %156 = shalt.err (!%p153_p10)
}
  0x19   :  { %s157_s30 = scalar_lea.vmem %s27_s12, 128  ;;  %p162_p12 = scmp.lt.s32.totalorder %s27_s12, %s27_s12 }
  0x1a   :  { %p158_p11 = scmp.ne.s32.totalorder %s27_s12, %s157_s30  ;;  %p163_p13 = scmp.lt.s32.totalorder %s157_s30, %s157_s30 }
  0x1c   :  { %p164_p0 = por %p163_p13, %p162_p12 }
  0x1e   :  { %p165_p1 = pnand %p164_p0, %p158_p11 }
  0x20   :  { %168 = shalt.err (!%p165_p1)
}
  0x21   :  { %29 = dma.hbm_to_vmem [thread:$0]  %s252_s1, 128, %s27_s12, [#allocation6]  }
  0x22   :  { %191 = dma.done.wait [#allocation3], 128  }
  0x23   :  { %192 = vsyncadd [#allocation3], 4294967168 }
  0x24   :  { %193 = dma.done.wait [#allocation6], 128  }
  0x25   :  { %194 = vsyncadd [#allocation6], 4294967168  ;;  %v36_v0 = vld [vmem:[#allocation5] sm:$0xff]  ;;  %v43_v6 = vld [vmem:[#allocation2] sm:$0xff]  ;;  %vm77_vm0 = vcmask 64512   ;;  %v85_v14 = vlaneseq  ;;  %s199_s1 = smov [#allocation7]  }
  0x26   :  { %121 = vlog2.f32 %v36_v0  ;;  %s107_s4 = sshll.u32 %s199_s1, 4  ;;  %vm99_vm4 = vcmask 57344   ;;  %s108_s4 = int_to_ptr.vmem [resolvable:$true] %s107_s4 }
  0x27   :  { %v86_v17 = vshrl.u32 %v85_v14, 7  ;;  %s169_s5 = scalar_lea.vmem %s108_s4, 16  ;;  %s173_s6 = scalar_lea.vmem %s108_s4, 32 }
  0x28   :  { %p170_p2 = scmp.ne.s32.totalorder %s108_s4, %s169_s5  ;;  %p174_p3 = scmp.lt.s32.totalorder %s108_s4, %s108_s4 }
  0x29   :  { %p175_p4 = scmp.lt.s32.totalorder %s173_s6, %s169_s5 }
  0x2b   :  { %p176_p5 = por %p175_p4, %p174_p3 }
  0x2d   :  { %p177_p6 = pnand %p176_p5, %p170_p2 }
  0x30   :  { %v122_v1 = vpop.eup %121 }
  0x31   :  { %v38_v2 = vmul.f32 0.6931472, %v122_v1 }
  0x33   :  { %v39_v3 = vsub.f32 0.0, %v38_v2 }
  0x35   :  { %123 = vlog2.f32 %v39_v3 }
  0x3f   :  { %v124_v4 = vpop.eup %123 }
  0x40   :  { %v41_v5 = vmul.f32 0.6931472, %v124_v4 }
  0x42   :  { %v42_v7 = vsub.f32 0.0, %v41_v5 }
  0x44   :  { %v44_v8 = vadd.f32 %v43_v6, %v42_v7 }
  0x46   :  { %45 = vxpose.xlu0.b32.start.end [1/1] (short) (narrow) %v44_v8, 8 }
  0xc6   :  { %v61_v9 = vpop.trf.xlu0 }
  0xc7   :  { %v78_v10 = vsel %vm77_vm0, %v61_v9, -inf }
  0xc8   :  { %v79_v11 = vrot.slane %v78_v10, 4 }
  0xca   :  { %v80_v12 = vmax.f32 %v78_v10, %v79_v11 }
  0xcc   :  { %v81_v13 = vrot.slane %v80_v12, 2 }
  0xce   :  { %v82_v15 = vmax.f32 %v80_v12, %v81_v13 }
  0xd0   :  { %v83_v16 = vrot.slane %v82_v15, 1 }
  0xd2   :  { %v84_v18 = vmax.f32 %v82_v15, %v83_v16 }
  0xd4   :  { %vm87_vm1 = vcmp.ge.f32.partialorder %v61_v9, %v84_v18 }
  0xd5   :  { %v88_v19 = vsel %vm87_vm1, %v86_v17, 7 }
  0xd6   :  { %v89_v20 = vsel %vm77_vm0, %v88_v19, 2147483647 }
  0xd7   :  { %v90_v21 = vrot.slane %v89_v20, 4 }
  0xd9   :  { %vm91_vm2 = vcmp.lt.s32.totalorder %v89_v20, %v90_v21 }
  0xda   :  { %v92_v22 = vsel %vm91_vm2, %v89_v20, %v90_v21 }
  0xdb   :  { %v93_v23 = vrot.slane %v92_v22, 2 }
  0xdd   :  { %vm94_vm3 = vcmp.lt.s32.totalorder %v92_v22, %v93_v23 }
  0xde   :  { %v95_v24 = vsel %vm94_vm3, %v92_v22, %v93_v23 }
  0xdf   :  { %v96_v25 = vrot.slane %v95_v24, 1 }
  0xe1   :  { %vm97_vm5 = vcmp.lt.s32.totalorder %v95_v24, %v96_v25 }
  0xe2   :  { %v98_v26 = vsel %vm97_vm5, %v95_v24, %v96_v25 }
  0xe3   :  { %100 = vst.msk [vmem:[#allocation7] sm:$0x1] %vm99_vm4, %v98_v26 }
  0xe4   :  { %180 = shalt.err (!%p177_p6)
}
  0xe5   :  { %s181_s9 = scalar_lea.hbm %s253_s2, 16 }
  0xe6   :  { %p182_p7 = scmp.ne.s32.totalorder %s253_s2, %s181_s9  ;;  %p185_p8 = scmp.lt.u32.totalorder %s181_s9, %s253_s2 }
  0xe8   :  { %p187_p9 = pnand %p185_p8, %p182_p7 }
  0xea   :  { %190 = shalt.err (!%p187_p9)
}
  0xeb   :  { %110 = dma.vmem_to_hbm [thread:$0]  %s108_s4, 16, %s253_s2, [#allocation4]  }
  0xec   :  { %195 = dma.done.wait [#allocation4], 16  }
  0xed   :  { %196 = vsyncadd [#allocation4], 4294967280 }
  0xee   :  { %114 = vsyncpa [#allocation3], 1 }
  0xef   :  { %115 = vsyncpa [#allocation6], 1 }
  0xf0   :  { %116 = vsyncpa [#allocation4], 1 }

</bundles_post_ra>
